<compile_context>
chip_gen: v6e
topology: v6e:2x2x1
jax: 0.10.0
libtpu: 0.0.40
codegen_flags: <defaults>
</compile_context>

<pallas_src>
import math
import functools

import jax
import jax.numpy as jnp
from jax.experimental import pallas as pl
from jax.experimental.pallas import tpu as pltpu


# --------------------------------------------------------------------------- helpers

def _sublane(itemsize):
    # Sublane-packing multiple: 8 for 4-byte, 16 for 2-byte, 32 for 1-byte dtypes.
    return max(8, 32 // max(1, itemsize))


def _vmem_capacity_bytes():
    """Per-core VMEM capacity; conservative (v7x-sized) fallback if unqueryable."""
    try:
        info = pltpu.get_tpu_info()
        cap = getattr(info, "vmem_capacity_bytes", None)
        if cap:
            return int(cap)
    except Exception:
        pass
    return 64 * 1024 * 1024


def _choose_group_patches(patch_len, P):
    """Patches per output slab: smallest group whose lane width is a multiple of 128
    (aligned, unmasked stores) while keeping the live slab small."""
    g = 128 // math.gcd(patch_len, 128)          # lcm(patch_len, 128) / patch_len
    if g * patch_len > 1024:                     # degenerate patch_len; cap slab width
        g = max(1, 512 // patch_len)
    return max(1, min(g, P))


def _choose_rows_tile(rows, in_lanes, out_lanes, itemsize):
    """Row-chunk size: sublane-aligned, generation-gated VMEM budget, ~8+ grid steps."""
    sub = _sublane(itemsize)
    cap = _vmem_capacity_bytes()
    if cap >= 96 * 1024 * 1024:      # v5e / v6e: 128 MiB physical VMEM
        budget = 48 * 1024 * 1024
        hard_cap = 2048
    else:                            # v7x: 64 MiB per TensorCore
        budget = 24 * 1024 * 1024
        hard_cap = 1024
    # Double-buffered input + double-buffered output resident per row.
    per_row_resident = max(1, 2 * (in_lanes + out_lanes) * itemsize)
    vmem_rows = max(sub, (budget // per_row_resident) // sub * sub)
    # Aim for >= ~8 grid steps (pipelining; both TCs on v7x) ...
    step_rows = -(-rows // 8)
    # ... but keep each step moving >= ~64 KiB so the ~0.35us/step overhead stays hidden.
    floor_rows = -(-(64 * 1024) // max(1, (in_lanes + out_lanes) * itemsize))
    target = max(step_rows, floor_rows)
    target = max(sub, -(-target // sub) * sub)   # round up to a sublane multiple
    tile = min(rows, hard_cap, vmem_rows, target)
    if tile < rows:
        tile = max(sub, (tile // sub) * sub)     # chunked tiles must be sublane-aligned
    return min(tile, rows)


# --------------------------------------------------------------------------- kernel

def _patching_kernel(x_ref, o_ref, *, L, patch_len, stride, P, group_patches):
    x = x_ref[...]                                   # (R, L) row block
    R = x.shape[0]
    needed = (P - 1) * stride + patch_len            # x_pad columns actually consumed
    out_w = P * patch_len

    if stride == patch_len:
        # Fast path (non-overlapping patches): output == x_pad[:, :out_w].
        # Main body is a pure contiguous copy; replication tail is a tiny epilogue slab.
        n_copy = min(needed, L)
        o_ref[:, :n_copy] = x[:, :n_copy]
        if needed > L:
            o_ref[:, n_copy:out_w] = jnp.broadcast_to(x[:, L - 1:L], (R, out_w - n_copy))
        return

    # General (overlapping) path: store patch GROUPS directly into o_ref.  Each group
    # is a lane-aligned slab (width multiple of 128 whenever patch_len allows), so only
    # a small slab is ever live -> no whole-tile concatenate, no forced spills.
    last = x[:, L - 1:L]                             # replication-pad source column
    for g0 in range(0, P, group_patches):
        g1 = min(P, g0 + group_patches)
        pieces = []
        for p in range(g0, g1):
            s0 = p * stride
            e0 = s0 + patch_len
            if e0 <= L:
                pieces.append(x[:, s0:e0])
            else:
                # Boundary patch (only in the last group(s)): valid prefix + replicated tail.
                if s0 < L:
                    pieces.append(x[:, s0:L])
                pieces.append(jnp.broadcast_to(last, (R, e0 - max(s0, L))))
        val = pieces[0] if len(pieces) == 1 else jnp.concatenate(pieces, axis=1)
        o_ref[:, g0 * patch_len:g1 * patch_len] = val


# --------------------------------------------------------------------------- wrapper

def patching_forward(x, *, patch_len, stride, padding, rows_tile=None):
    """x: [B, C, L] -> (patches [B, C, P, patch_len], n_vars=C)."""
    B, C, L = x.shape
    if patch_len > L + padding:
        raise ValueError("patch_len must be <= seq_len + padding")
    P = (L + padding - patch_len) // stride + 1
    if P < 1:
        raise ValueError("configuration yields zero patches")

    rows = B * C
    out_lanes = P * patch_len
    itemsize = x.dtype.itemsize
    sub = _sublane(itemsize)
    x2 = x.reshape(rows, L)                          # free contiguous reshape

    if rows_tile is None:
        rows_tile = _choose_rows_tile(rows, L, out_lanes, itemsize)
    else:
        # Validate user override: chunked tiles must be sublane-aligned for the dtype.
        rows_tile = min(int(rows_tile), rows)
        if rows_tile < rows and rows_tile % sub != 0:
            rows_tile = max(sub, (rows_tile // sub) * sub)

    vmem_limit = (64 if _vmem_capacity_bytes() >= 96 * 1024 * 1024 else 48) * 1024 * 1024

    kernel = functools.partial(
        _patching_kernel, L=L, patch_len=patch_len, stride=stride, P=P,
        group_patches=_choose_group_patches(patch_len, P))

    out2 = pl.pallas_call(
        kernel,
        out_shape=jax.ShapeDtypeStruct((rows, out_lanes), x.dtype),
        grid=(pl.cdiv(rows, rows_tile),),
        in_specs=[pl.BlockSpec((rows_tile, L), lambda i: (i, 0))],
        out_specs=pl.BlockSpec((rows_tile, out_lanes), lambda i: (i, 0)),
        compiler_params=pltpu.CompilerParams(
            dimension_semantics=("parallel",),
            vmem_limit_bytes=vmem_limit,
        ),
        cost_estimate=pl.CostEstimate(
            flops=0, transcendentals=0,
            bytes_accessed=rows * (L + out_lanes) * itemsize),
    )(x2)

    # Free reshape back to the PyTorch output layout.
    return out2.reshape(B, C, P, patch_len), C


# ------------------------------------------------------------- module parameter mirror

def make_unused_params(d_model, patch_len, max_len=5000, key=jax.random.PRNGKey(42)):
    """Deterministic init of the module's parameters/buffers.
    NOTE: Patching.forward() does NOT use these (it only pads + unfolds);
    they are initialized here only to mirror __init__."""
    bound = 1.0 / math.sqrt(patch_len)
    w_value = jax.random.uniform(key, (d_model, patch_len), jnp.float32, -bound, bound)
    position = jnp.arange(0, max_len, dtype=jnp.float32)[:, None]
    div_term = jnp.exp(
        jnp.arange(0, d_model, 2, dtype=jnp.float32) * -(math.log(10000.0) / d_model))
    pe = jnp.zeros((max_len, d_model), jnp.float32)
    pe = pe.at[:, 0::2].set(jnp.sin(position * div_term))
    pe = pe.at[:, 1::2].set(jnp.cos(position * div_term))
    return w_value, pe[None]


# --------------------------------------------------------------------------- testing

def _reference(x, patch_len, stride, padding):
    B, C, L = x.shape
    P = (L + padding - patch_len) // stride + 1
    if padding > 0:
        x_pad = jnp.concatenate(
            [x, jnp.broadcast_to(x[:, :, L - 1:L], (B, C, padding))], axis=-1)
    else:
        x_pad = x
    return jnp.stack(
        [x_pad[:, :, p * stride: p * stride + patch_len] for p in range(P)], axis=2)


def _check(x, patch_len, stride, padding, rows_tile=None):
    patches, nv = patching_forward(
        x, patch_len=patch_len, stride=stride, padding=padding, rows_tile=rows_tile)
    patches = jax.block_until_ready(patches)
    ref = _reference(x, patch_len, stride, padding)
    assert nv == x.shape[1]
    assert patches.shape == ref.shape, (patches.shape, ref.shape)
    assert jnp.allclose(patches, ref), "mismatch vs reference"


if __name__ == "__main__":
    key = jax.random.PRNGKey(0)

    # Parameters from __init__ (unused by forward, initialized deterministically).
    _w_value, _pe = make_unused_params(d_model=32, patch_len=8)

    # 1) Small shape matching the module example (padding makes last patch cross L).
    x1 = jax.random.normal(key, (2, 4, 16), dtype=jnp.float32)
    _check(x1, patch_len=8, stride=4, padding=4)

    # 2) PatchTST-style config, single full-row block (rows < sublane multiple of 8 steps).
    x2 = jax.random.normal(jax.random.fold_in(key, 1), (3, 5, 96), dtype=jnp.float32)
    _check(x2, patch_len=16, stride=8, padding=8)

    # 3) Multi-block grid with a partial last row-block (exercises pipelining path).
    x3 = jax.random.normal(jax.random.fold_in(key, 2), (6, 8, 64), dtype=jnp.float32)
    _check(x3, patch_len=16, stride=8, padding=8, rows_tile=32)

    # 4) Non-overlapping patches: pure-copy fast path + replicated-tail epilogue.
    x4 = jax.random.normal(jax.random.fold_in(key, 3), (2, 4, 64), dtype=jnp.float32)
    _check(x4, patch_len=16, stride=16, padding=16)

    # 5) Larger rows: auto tile selection -> multi-step parallel grid (8 steps).
    x5 = jax.random.normal(jax.random.fold_in(key, 4), (16, 32, 96), dtype=jnp.float32)
    _check(x5, patch_len=16, stride=8, padding=8)

    print("KERNEL_OK")
</pallas_src>

<mosaic_0001>
module attributes {stable_mosaic.version = 11 : i64} {
  func.func @_patching_kernel(%arg0: i32, %arg1: memref<8x16xf32, #tpu.memory_space<vmem>>, %arg2: memref<8x32xf32, #tpu.memory_space<vmem>>) attributes {dimension_semantics = [#tpu.dimension_semantics<parallel>], iteration_bounds = array<i64: 1>, scalar_prefetch = 0 : i64, scratch_operands = 0 : i64, tpu.core_type = #tpu.core_type<tc>, window_params = [{transform_indices = @transform_0, window_bounds = array<i64: 8, 16>}, {transform_indices = @transform_1, window_bounds = array<i64: 8, 32>}]} {
    %c0 = arith.constant 0 : index
    %c0_0 = arith.constant 0 : index
    %0 = vector.load %arg1[%c0, %c0_0] : memref<8x16xf32, #tpu.memory_space<vmem>>, vector<8x16xf32>
    %1 = vector.extract_strided_slice %0 {offsets = [0, 15], sizes = [8, 1], strides = [1, 1]} : vector<8x16xf32> to vector<8x1xf32>
    %2 = vector.extract_strided_slice %0 {offsets = [0, 0], sizes = [8, 8], strides = [1, 1]} : vector<8x16xf32> to vector<8x8xf32>
    %3 = vector.extract_strided_slice %0 {offsets = [0, 4], sizes = [8, 8], strides = [1, 1]} : vector<8x16xf32> to vector<8x8xf32>
    %4 = vector.extract_strided_slice %0 {offsets = [0, 8], sizes = [8, 8], strides = [1, 1]} : vector<8x16xf32> to vector<8x8xf32>
    %5 = vector.extract_strided_slice %0 {offsets = [0, 12], sizes = [8, 4], strides = [1, 1]} : vector<8x16xf32> to vector<8x4xf32>
    %6 = vector.shape_cast %1 : vector<8x1xf32> to vector<8x1xf32>
    %7 = vector.broadcast %6 : vector<8x1xf32> to vector<8x4xf32>
    %8 = tpu.concatenate %2, %3, %4, %5, %7 in 1 : vector<8x8xf32>, vector<8x8xf32>, vector<8x8xf32>, vector<8x4xf32>, vector<8x4xf32> -> vector<8x32xf32>
    %c0_1 = arith.constant 0 : index
    %c0_2 = arith.constant 0 : index
    %9 = vector.load %arg2[%c0_1, %c0_2] : memref<8x32xf32, #tpu.memory_space<vmem>>, vector<8x32xf32>
    tpu.vector_store %arg2[%c0_1, %c0_2], %8 {strides = array<i32>} : memref<8x32xf32, #tpu.memory_space<vmem>>, vector<8x32xf32>,
    return
  }
  func.func @transform_0(%arg0: i32) -> (i32, i32) {
    %c0_i32 = arith.constant 0 : i32
    %c0_i32_0 = arith.constant 0 : i32
    return %arg0, %c0_i32 : i32, i32
  }
  func.func @transform_1(%arg0: i32) -> (i32, i32) {
    %c0_i32 = arith.constant 0 : i32
    %c0_i32_0 = arith.constant 0 : i32
    return %arg0, %c0_i32 : i32, i32
  }
}

</mosaic_0001>

<bundles_post_ra>
// kernel: tpu_custom_call.1
= control target key start
LH: loop header
LB: loop body
LE: loop exit
PB: predicated region body
PF: predicated region fallthrough
CT: control target
= control target key end

     0   :  { %6 = vsyncpa [#allocation3], 0  ;;  %s134_s0 = inlined_call_operand.hbm [shape: f32[8,16], index: 0, kind: input, shape index: {}]   ;;  %s135_s1 = inlined_call_operand.hbm [shape: f32[8,32], index: 1, kind: output, shape index: {}]  }
   0x1   :  { %7 = vsyncpa [#allocation4], 0  ;;  %s112_s6 = smov [#allocation2]  }
   0x2   :  { %s14_s7 = sshll.u32 %s112_s6, 4  ;;  %s15_s7 = int_to_ptr.vmem [resolvable:$true] %s14_s7 }
   0x3   :  { %s76_s8 = scalar_lea.vmem %s15_s7, 128  ;;  %p81_p1 = scmp.lt.s32.totalorder %s15_s7, %s15_s7 }
   0x4   :  { %p77_p0 = scmp.ne.s32.totalorder %s15_s7, %s76_s8  ;;  %p82_p2 = scmp.lt.s32.totalorder %s76_s8, %s76_s8 }
   0x6   :  { %p83_p3 = por %p82_p2, %p81_p1 }
   0x8   :  { %p84_p4 = pnand %p83_p3, %p77_p0 }
   0xa   :  { %87 = shalt.err (!%p84_p4)
}
   0xb   :  { %17 = dma.hbm_to_vmem [thread:$0]  %s134_s0, 128, %s15_s7, [#allocation3]  }
   0xc   :  { %108 = dma.done.wait [#allocation3], 128  }
   0xd   :  { %109 = vsyncadd [#allocation3], 4294967168  ;;  %v113_v0 = vmov 15   ;;  %v21_v1 = vld [vmem:[#allocation2] sm:$0xff]  ;;  %s114_s11 = smov 8   ;;  %s115_s12 = smov 4  }
   0xe   :  { %67 = vset.pattern.permute.xlu0 %v113_v0  ;;  %30 = vrot.lane.b32.xlu1 %v21_v1, %s114_s11  ;;  %s116_s13 = smov 12   ;;  %vm36_vm0 = vcmask 64512   ;;  %vm38_vm1 = vcmask 130048   ;;  %vm40_vm2 = vcmask 195584   ;;  %s117_s0 = smov [#allocation5]   ;;  %vm42_vm3 = vcmask 228352  }
   0xf   :  { %24 = vperm.xlu0 %67, %v21_v1   ;;  %s52_s14 = sshll.u32 %s117_s0, 4  ;;  %vm44_vm4 = vcmask 261120   ;;  %s53_s14 = int_to_ptr.vmem [resolvable:$true] %s52_s14 }
  0x10   :  { %s88_s15 = scalar_lea.vmem %s53_s14, 128  ;;  %p93_p6 = scmp.lt.s32.totalorder %s53_s14, %s53_s14 }
  0x11   :  { %p89_p5 = scmp.ne.s32.totalorder %s53_s14, %s88_s15  ;;  %p94_p7 = scmp.lt.s32.totalorder %s88_s15, %s88_s15 }
  0x12   :  { %33 = vrot.lane.b32.xlu1 %v21_v1, %s116_s13 }
  0x13   :  { %27 = vrot.lane.b32.xlu0 %v21_v1, %s115_s12  ;;  %p95_p8 = por %p94_p7, %p93_p6 }
  0x15   :  { %p96_p9 = pnand %p95_p8, %p89_p5 }
  0x80   :  { %v31_v2 = vpop.permute.xlu1 %30 }
  0x84   :  { %v34_v5 = vpop.permute.xlu1 %33 }
  0x8a   :  { %v25_v3 = vpop.permute.xlu0 %24 }
  0x8e   :  { %v28_v4 = vpop.permute.xlu0 %27 }
  0x8f   :  { %v37_v6 = vsel %vm36_vm0, %v21_v1, %v28_v4 }
  0x90   :  { %v39_v7 = vsel %vm38_vm1, %v37_v6, %v31_v2 }
  0x91   :  { %v41_v8 = vsel %vm40_vm2, %v39_v7, %v34_v5 }
  0x92   :  { %v43_v9 = vsel %vm42_vm3, %v41_v8, %v25_v3 }
  0x93   :  { %45 = vst.msk [vmem:[#allocation5] sm:$0xff] %vm44_vm4, %v43_v9 }
  0x94   :  { %99 = shalt.err (!%p96_p9)
}
  0x95   :  { %55 = dma.vmem_to_hbm [thread:$0]  %s53_s14, 128, %s135_s1, [#allocation4]  }
  0x96   :  { %110 = dma.done.wait [#allocation4], 128  }
  0x97   :  { %111 = vsyncadd [#allocation4], 4294967168 }
  0x98   :  { %59 = vsyncpa [#allocation3], 1 }
  0x99   :  { %60 = vsyncpa [#allocation4], 1 }

</bundles_post_ra>
